<compile_context>
chip_gen: v6e
topology: v6e:2x2x1
jax: 0.10.0
libtpu: 0.0.40
codegen_flags: <defaults>
</compile_context>

<pallas_src>
import jax
import jax.numpy as jnp
from jax.experimental import pallas as pl
from jax.experimental.pallas import tpu as pltpu

BN_EPS = 1e-5
GIN_EPS = 1e-5  # GINConv init_eps: the module spec passes 1e-05 explicitly.


# ---------------------------------------------------------------------------
# Fused Pallas kernel (all GIN layers + output Linear in one call)
# ---------------------------------------------------------------------------
def make_gin_fused_kernel(num_layers, num_nodes):
    """Ref layout:
       adj_eps   : (N, N)        adjacency with (1+eps)*I folded in
       h0        : (N, F_in)     input node features
       w1_first  : (F_in, H)     layer-0 first Linear weight
       w_stack   : (2L-1, H, H)  [w2_0, w1_1, w2_1, ..., w1_{L-1}, w2_{L-1}]
       rowvecs   : (3L, H)       [gamma_i, beta_i, b2_i] per layer
       wo_pad    : (H, P)        output Linear weight, lane-padded to P (mult of 128)
       bo_pad    : (1, P)        output Linear bias, lane-padded
       out       : (N, P)
    """
    inv_n = 1.0 / float(num_nodes)

    def kernel(adj_ref, h0_ref, w1_first_ref, w_stack_ref, rv_ref,
               wo_ref, bo_ref, out_ref):
        a = adj_ref[...]                                   # (N, N)
        h = h0_ref[...]                                    # (N, F_in)
        rv = rv_ref[...]                                   # (3L, H)
        ones_row = jnp.ones((1, a.shape[0]), jnp.float32)  # hoisted constant

        for i in range(num_layers):
            # --- sum aggregation + self term in one MXU pass --------------
            # (1+eps)*I is pre-folded into `a`, so no extra VALU FMA here.
            z = jnp.dot(a, h, preferred_element_type=jnp.float32)

            # --- Linear 1 (bias dropped: BN mean-subtraction cancels it) --
            w1 = w1_first_ref[...] if i == 0 else w_stack_ref[2 * i - 1]
            y = jnp.dot(z, w1, preferred_element_type=jnp.float32)

            # --- BatchNorm1d: single-pass stats, node-axis sums on MXU ----
            s = jnp.dot(ones_row, y, preferred_element_type=jnp.float32)
            ss = jnp.dot(ones_row, y * y, preferred_element_type=jnp.float32)
            mean = s * inv_n
            var = jnp.maximum(ss * inv_n - mean * mean, 0.0)
            gamma = rv[3 * i:3 * i + 1, :]
            beta = rv[3 * i + 1:3 * i + 2, :]
            scale = gamma * jax.lax.rsqrt(var + BN_EPS)
            shift = beta - mean * scale
            y = jnp.maximum(y * scale + shift, 0.0)        # BN + ReLU (one FMA)

            # --- Linear 2 + ReLU ------------------------------------------
            w2 = w_stack_ref[2 * i]
            b2 = rv[3 * i + 2:3 * i + 3, :]
            h = jnp.maximum(
                jnp.dot(y, w2, preferred_element_type=jnp.float32) + b2, 0.0)

        # --- output Linear; lane-padded slab -> unmasked store ------------
        out_ref[...] = (
            jnp.dot(h, wo_ref[...], preferred_element_type=jnp.float32)
            + bo_ref[...])

    return kernel


# ---------------------------------------------------------------------------
# Wrapper: one pallas_call for the whole forward pass
# ---------------------------------------------------------------------------
def gin_forward(adj, node_feat, params, eps=GIN_EPS):
    num_layers = len(params["layers"])
    n = adj.shape[0]
    hidden = params["layers"][0]["w2"].shape[0]
    out_size = params["wo"].shape[1]
    out_pad = ((out_size + 127) // 128) * 128  # lane-dense output width

    # Fold the GIN self term into the adjacency (diag of `adj` is zero).
    adj_eps = adj + (1.0 + float(eps)) * jnp.eye(n, dtype=adj.dtype)

    # Pack same-shaped square weights: [w2_0, w1_1, w2_1, ..., w1_{L-1}, w2_{L-1}]
    sq = [params["layers"][0]["w2"]]
    for layer in params["layers"][1:]:
        sq += [layer["w1"], layer["w2"]]
    w_stack = jnp.stack(sq)                                  # (2L-1, H, H)

    # Pack per-layer row vectors: [gamma_i, beta_i, b2_i].  b1 is dropped
    # on purpose (BatchNorm mean subtraction cancels it exactly).
    rows = []
    for layer in params["layers"]:
        rows += [layer["gamma"], layer["beta"], layer["b2"]]
    rowvecs = jnp.stack(rows)                                # (3L, H)

    w1_first = params["layers"][0]["w1"]                     # (F_in, H)

    wo_pad = jnp.zeros((hidden, out_pad), jnp.float32)
    wo_pad = wo_pad.at[:, :out_size].set(params["wo"])
    bo_pad = jnp.zeros((1, out_pad), jnp.float32)
    bo_pad = bo_pad.at[:, :out_size].set(params["bo"].reshape(1, -1))

    vmem = pl.BlockSpec(memory_space=pltpu.MemorySpace.VMEM)
    out_padded = pl.pallas_call(
        make_gin_fused_kernel(num_layers, n),
        out_shape=jax.ShapeDtypeStruct((n, out_pad), jnp.float32),
        in_specs=[vmem] * 7,
        out_specs=vmem,
    )(adj_eps, node_feat, w1_first, w_stack, rowvecs, wo_pad, bo_pad)

    return out_padded[:, :out_size]


# ---------------------------------------------------------------------------
# Pure-JAX reference (keeps b1 and two-pass BN stats — validates the
# algebraic simplifications in the kernel)
# ---------------------------------------------------------------------------
def gin_forward_ref(adj, node_feat, params, eps=GIN_EPS):
    h = node_feat
    for layer in params["layers"]:
        agg = adj @ h
        z = (1.0 + eps) * h + agg
        y = z @ layer["w1"] + layer["b1"]
        mean = jnp.mean(y, axis=0, keepdims=True)
        var = jnp.mean((y - mean) ** 2, axis=0, keepdims=True)
        y = (y - mean) * jax.lax.rsqrt(var + BN_EPS) * layer["gamma"] + layer["beta"]
        y = jnp.maximum(y, 0.0)
        y = y @ layer["w2"] + layer["b2"]
        h = jnp.maximum(y, 0.0)
    return h @ params["wo"] + params["bo"]


# ---------------------------------------------------------------------------
# Deterministic parameter / input construction
# ---------------------------------------------------------------------------
def init_params(key, in_size, hidden_size, out_size, num_layers):
    params = {"layers": []}
    for i in range(num_layers):
        key, k1, k2, k3, k4, k5, k6 = jax.random.split(key, 7)
        d_in = in_size if i == 0 else hidden_size
        params["layers"].append({
            "w1": 0.1 * jax.random.normal(k1, (d_in, hidden_size), jnp.float32),
            # non-zero b1 on purpose: the kernel drops it (BN cancels it) and
            # the reference keeps it — allclose proves the algebra.
            "b1": 0.1 * jax.random.normal(k3, (hidden_size,), jnp.float32),
            "gamma": 1.0 + 0.1 * jax.random.normal(k4, (hidden_size,), jnp.float32),
            "beta": 0.1 * jax.random.normal(k5, (hidden_size,), jnp.float32),
            "w2": 0.1 * jax.random.normal(k2, (hidden_size, hidden_size), jnp.float32),
            "b2": 0.1 * jax.random.normal(k6, (hidden_size,), jnp.float32),
        })
    key, ko, kb = jax.random.split(key, 3)
    params["wo"] = 0.1 * jax.random.normal(ko, (hidden_size, out_size), jnp.float32)
    params["bo"] = 0.1 * jax.random.normal(kb, (out_size,), jnp.float32)
    return params


def build_adjacency(key, num_nodes, edge_prob=0.1):
    # Random directed graph (dense adjacency, A[dst, src] = 1) plus a ring so
    # every node has at least one in-neighbor. No self loops (the self term is
    # handled via the (1+eps)*I folded in by the wrapper).
    rand = jax.random.uniform(key, (num_nodes, num_nodes))
    adj = (rand < edge_prob).astype(jnp.float32)
    ring = jnp.roll(jnp.eye(num_nodes, dtype=jnp.float32), 1, axis=1)
    adj = jnp.clip(adj + ring, 0.0, 1.0)
    adj = adj * (1.0 - jnp.eye(num_nodes, dtype=jnp.float32))
    return adj


# ---------------------------------------------------------------------------
# Main
# ---------------------------------------------------------------------------
if __name__ == "__main__":
    data_info = {"num_nodes": 64, "in_size": 16, "out_size": 8}
    hidden_size = 32
    num_layers = 3

    key = jax.random.PRNGKey(0)
    k_feat, k_adj, k_par = jax.random.split(key, 3)

    node_feat = jax.random.normal(
        k_feat, (data_info["num_nodes"], data_info["in_size"]), jnp.float32)
    adj = build_adjacency(k_adj, data_info["num_nodes"])
    params = init_params(k_par, data_info["in_size"], hidden_size,
                         data_info["out_size"], num_layers)

    out = gin_forward(adj, node_feat, params)
    jax.block_until_ready(out)

    assert out.shape == (data_info["num_nodes"], data_info["out_size"])
    assert out.dtype == jnp.float32

    # Validate against the pure-JAX reference (same f32 math; loose tolerance
    # for MXU vs XLA accumulation-order differences).
    ref = gin_forward_ref(adj, node_feat, params)
    assert jnp.allclose(out, ref, rtol=1e-2, atol=1e-2), "mismatch vs reference"

    print("KERNEL_OK")
</pallas_src>

<mosaic_0001>
module attributes {stable_mosaic.version = 11 : i64} {
  func.func @kernel(%arg0: memref<64x64xf32, #tpu.memory_space<vmem>>, %arg1: memref<64x16xf32, #tpu.memory_space<vmem>>, %arg2: memref<16x32xf32, #tpu.memory_space<vmem>>, %arg3: memref<5x32x32xf32, #tpu.memory_space<vmem>>, %arg4: memref<9x32xf32, #tpu.memory_space<vmem>>, %arg5: memref<32x128xf32, #tpu.memory_space<vmem>>, %arg6: memref<1x128xf32, #tpu.memory_space<vmem>>, %arg7: memref<64x128xf32, #tpu.memory_space<vmem>>) attributes {dimension_semantics = [], scalar_prefetch = 0 : i64, scratch_operands = 0 : i64, tpu.core_type = #tpu.core_type<tc>} {
    %c0 = arith.constant 0 : index
    %c0_0 = arith.constant 0 : index
    %0 = vector.load %arg0[%c0, %c0_0] : memref<64x64xf32, #tpu.memory_space<vmem>>, vector<64x64xf32>
    %c0_1 = arith.constant 0 : index
    %c0_2 = arith.constant 0 : index
    %1 = vector.load %arg1[%c0_1, %c0_2] : memref<64x16xf32, #tpu.memory_space<vmem>>, vector<64x16xf32>
    %c0_3 = arith.constant 0 : index
    %c0_4 = arith.constant 0 : index
    %2 = vector.load %arg4[%c0_3, %c0_4] : memref<9x32xf32, #tpu.memory_space<vmem>>, vector<9x32xf32>
    %cst = arith.constant 1.000000e+00 : f32
    %3 = vector.broadcast %cst : f32 to vector<1x64xf32>
    %cst_5 = arith.constant dense<0.000000e+00> : vector<64x16xf32>
    %4 = tpu.matmul %0, %1, %cst_5 {dimension_numbers = #tpu.dot_dimension_numbers<[1], [0], [0], [1], [0, 0, 1, 1], [], []>} : vector<64x64xf32>, vector<64x16xf32>, vector<64x16xf32> -> vector<64x16xf32>
    %c0_6 = arith.constant 0 : index
    %c0_7 = arith.constant 0 : index
    %5 = vector.load %arg2[%c0_6, %c0_7] : memref<16x32xf32, #tpu.memory_space<vmem>>, vector<16x32xf32>
    %cst_8 = arith.constant dense<0.000000e+00> : vector<64x32xf32>
    %6 = tpu.matmul %4, %5, %cst_8 {dimension_numbers = #tpu.dot_dimension_numbers<[1], [0], [0], [1], [0, 0, 1, 1], [], []>} : vector<64x16xf32>, vector<16x32xf32>, vector<64x32xf32> -> vector<64x32xf32>
    %cst_9 = arith.constant dense<0.000000e+00> : vector<1x32xf32>
    %7 = tpu.matmul %3, %6, %cst_9 {dimension_numbers = #tpu.dot_dimension_numbers<[1], [0], [0], [1], [0, 0, 1, 1], [], []>} : vector<1x64xf32>, vector<64x32xf32>, vector<1x32xf32> -> vector<1x32xf32>
    %8 = arith.mulf %6, %6 : vector<64x32xf32>
    %cst_10 = arith.constant dense<0.000000e+00> : vector<1x32xf32>
    %9 = tpu.matmul %3, %8, %cst_10 {dimension_numbers = #tpu.dot_dimension_numbers<[1], [0], [0], [1], [0, 0, 1, 1], [], []>} : vector<1x64xf32>, vector<64x32xf32>, vector<1x32xf32> -> vector<1x32xf32>
    %cst_11 = arith.constant 1.562500e-02 : f32
    %10 = vector.broadcast %cst_11 : f32 to vector<1x32xf32>
    %11 = arith.mulf %7, %10 : vector<1x32xf32>
    %cst_12 = arith.constant 1.562500e-02 : f32
    %12 = vector.broadcast %cst_12 : f32 to vector<1x32xf32>
    %13 = arith.mulf %9, %12 : vector<1x32xf32>
    %14 = arith.mulf %11, %11 : vector<1x32xf32>
    %15 = arith.subf %13, %14 : vector<1x32xf32>
    %cst_13 = arith.constant 0.000000e+00 : f32
    %16 = vector.broadcast %cst_13 : f32 to vector<1x32xf32>
    %17 = arith.maximumf %15, %16 : vector<1x32xf32>
    %18 = vector.extract_strided_slice %2 {offsets = [0, 0], sizes = [1, 32], strides = [1, 1]} : vector<9x32xf32> to vector<1x32xf32>
    %19 = vector.extract_strided_slice %2 {offsets = [1, 0], sizes = [1, 32], strides = [1, 1]} : vector<9x32xf32> to vector<1x32xf32>
    %cst_14 = arith.constant 9.99999974E-6 : f32
    %20 = vector.broadcast %cst_14 : f32 to vector<1x32xf32>
    %21 = arith.addf %17, %20 : vector<1x32xf32>
    %22 = math.rsqrt %21 : vector<1x32xf32>
    %23 = arith.mulf %18, %22 : vector<1x32xf32>
    %24 = arith.mulf %11, %23 : vector<1x32xf32>
    %25 = arith.subf %19, %24 : vector<1x32xf32>
    %26 = vector.broadcast %23 : vector<1x32xf32> to vector<64x32xf32>
    %27 = arith.mulf %6, %26 : vector<64x32xf32>
    %28 = vector.broadcast %25 : vector<1x32xf32> to vector<64x32xf32>
    %29 = arith.addf %27, %28 : vector<64x32xf32>
    %cst_15 = arith.constant 0.000000e+00 : f32
    %30 = vector.broadcast %cst_15 : f32 to vector<64x32xf32>
    %31 = arith.maximumf %29, %30 : vector<64x32xf32>
    %c0_16 = arith.constant 0 : index
    %c0_17 = arith.constant 0 : index
    %c0_18 = arith.constant 0 : index
    %32 = vector.load %arg3[%c0_16, %c0_17, %c0_18] : memref<5x32x32xf32, #tpu.memory_space<vmem>>, vector<1x32x32xf32>
    %33 = vector.shape_cast %32 : vector<1x32x32xf32> to vector<32x32xf32>
    %34 = vector.extract_strided_slice %2 {offsets = [2, 0], sizes = [1, 32], strides = [1, 1]} : vector<9x32xf32> to vector<1x32xf32>
    %cst_19 = arith.constant dense<0.000000e+00> : vector<64x32xf32>
    %35 = tpu.matmul %31, %33, %cst_19 {dimension_numbers = #tpu.dot_dimension_numbers<[1], [0], [0], [1], [0, 0, 1, 1], [], []>} : vector<64x32xf32>, vector<32x32xf32>, vector<64x32xf32> -> vector<64x32xf32>
    %36 = vector.broadcast %34 : vector<1x32xf32> to vector<64x32xf32>
    %37 = arith.addf %35, %36 : vector<64x32xf32>
    %cst_20 = arith.constant 0.000000e+00 : f32
    %38 = vector.broadcast %cst_20 : f32 to vector<64x32xf32>
    %39 = arith.maximumf %37, %38 : vector<64x32xf32>
    %cst_21 = arith.constant dense<0.000000e+00> : vector<64x32xf32>
    %40 = tpu.matmul %0, %39, %cst_21 {dimension_numbers = #tpu.dot_dimension_numbers<[1], [0], [0], [1], [0, 0, 1, 1], [], []>} : vector<64x64xf32>, vector<64x32xf32>, vector<64x32xf32> -> vector<64x32xf32>
    %c1 = arith.constant 1 : index
    %c0_22 = arith.constant 0 : index
    %c0_23 = arith.constant 0 : index
    %41 = vector.load %arg3[%c1, %c0_22, %c0_23] : memref<5x32x32xf32, #tpu.memory_space<vmem>>, vector<1x32x32xf32>
    %42 = vector.shape_cast %41 : vector<1x32x32xf32> to vector<32x32xf32>
    %cst_24 = arith.constant dense<0.000000e+00> : vector<64x32xf32>
    %43 = tpu.matmul %40, %42, %cst_24 {dimension_numbers = #tpu.dot_dimension_numbers<[1], [0], [0], [1], [0, 0, 1, 1], [], []>} : vector<64x32xf32>, vector<32x32xf32>, vector<64x32xf32> -> vector<64x32xf32>
    %cst_25 = arith.constant dense<0.000000e+00> : vector<1x32xf32>
    %44 = tpu.matmul %3, %43, %cst_25 {dimension_numbers = #tpu.dot_dimension_numbers<[1], [0], [0], [1], [0, 0, 1, 1], [], []>} : vector<1x64xf32>, vector<64x32xf32>, vector<1x32xf32> -> vector<1x32xf32>
    %45 = arith.mulf %43, %43 : vector<64x32xf32>
    %cst_26 = arith.constant dense<0.000000e+00> : vector<1x32xf32>
    %46 = tpu.matmul %3, %45, %cst_26 {dimension_numbers = #tpu.dot_dimension_numbers<[1], [0], [0], [1], [0, 0, 1, 1], [], []>} : vector<1x64xf32>, vector<64x32xf32>, vector<1x32xf32> -> vector<1x32xf32>
    %cst_27 = arith.constant 1.562500e-02 : f32
    %47 = vector.broadcast %cst_27 : f32 to vector<1x32xf32>
    %48 = arith.mulf %44, %47 : vector<1x32xf32>
    %cst_28 = arith.constant 1.562500e-02 : f32
    %49 = vector.broadcast %cst_28 : f32 to vector<1x32xf32>
    %50 = arith.mulf %46, %49 : vector<1x32xf32>
    %51 = arith.mulf %48, %48 : vector<1x32xf32>
    %52 = arith.subf %50, %51 : vector<1x32xf32>
    %cst_29 = arith.constant 0.000000e+00 : f32
    %53 = vector.broadcast %cst_29 : f32 to vector<1x32xf32>
    %54 = arith.maximumf %52, %53 : vector<1x32xf32>
    %55 = vector.extract_strided_slice %2 {offsets = [3, 0], sizes = [1, 32], strides = [1, 1]} : vector<9x32xf32> to vector<1x32xf32>
    %56 = vector.extract_strided_slice %2 {offsets = [4, 0], sizes = [1, 32], strides = [1, 1]} : vector<9x32xf32> to vector<1x32xf32>
    %cst_30 = arith.constant 9.99999974E-6 : f32
    %57 = vector.broadcast %cst_30 : f32 to vector<1x32xf32>
    %58 = arith.addf %54, %57 : vector<1x32xf32>
    %59 = math.rsqrt %58 : vector<1x32xf32>
    %60 = arith.mulf %55, %59 : vector<1x32xf32>
    %61 = arith.mulf %48, %60 : vector<1x32xf32>
    %62 = arith.subf %56, %61 : vector<1x32xf32>
    %63 = vector.broadcast %60 : vector<1x32xf32> to vector<64x32xf32>
    %64 = arith.mulf %43, %63 : vector<64x32xf32>
    %65 = vector.broadcast %62 : vector<1x32xf32> to vector<64x32xf32>
    %66 = arith.addf %64, %65 : vector<64x32xf32>
    %cst_31 = arith.constant 0.000000e+00 : f32
    %67 = vector.broadcast %cst_31 : f32 to vector<64x32xf32>
    %68 = arith.maximumf %66, %67 : vector<64x32xf32>
    %c2 = arith.constant 2 : index
    %c0_32 = arith.constant 0 : index
    %c0_33 = arith.constant 0 : index
    %69 = vector.load %arg3[%c2, %c0_32, %c0_33] : memref<5x32x32xf32, #tpu.memory_space<vmem>>, vector<1x32x32xf32>
    %70 = vector.shape_cast %69 : vector<1x32x32xf32> to vector<32x32xf32>
    %71 = vector.extract_strided_slice %2 {offsets = [5, 0], sizes = [1, 32], strides = [1, 1]} : vector<9x32xf32> to vector<1x32xf32>
    %cst_34 = arith.constant dense<0.000000e+00> : vector<64x32xf32>
    %72 = tpu.matmul %68, %70, %cst_34 {dimension_numbers = #tpu.dot_dimension_numbers<[1], [0], [0], [1], [0, 0, 1, 1], [], []>} : vector<64x32xf32>, vector<32x32xf32>, vector<64x32xf32> -> vector<64x32xf32>
    %73 = vector.broadcast %71 : vector<1x32xf32> to vector<64x32xf32>
    %74 = arith.addf %72, %73 : vector<64x32xf32>
    %cst_35 = arith.constant 0.000000e+00 : f32
    %75 = vector.broadcast %cst_35 : f32 to vector<64x32xf32>
    %76 = arith.maximumf %74, %75 : vector<64x32xf32>
    %cst_36 = arith.constant dense<0.000000e+00> : vector<64x32xf32>
    %77 = tpu.matmul %0, %76, %cst_36 {dimension_numbers = #tpu.dot_dimension_numbers<[1], [0], [0], [1], [0, 0, 1, 1], [], []>} : vector<64x64xf32>, vector<64x32xf32>, vector<64x32xf32> -> vector<64x32xf32>
    %c3 = arith.constant 3 : index
    %c0_37 = arith.constant 0 : index
    %c0_38 = arith.constant 0 : index
    %78 = vector.load %arg3[%c3, %c0_37, %c0_38] : memref<5x32x32xf32, #tpu.memory_space<vmem>>, vector<1x32x32xf32>
    %79 = vector.shape_cast %78 : vector<1x32x32xf32> to vector<32x32xf32>
    %cst_39 = arith.constant dense<0.000000e+00> : vector<64x32xf32>
    %80 = tpu.matmul %77, %79, %cst_39 {dimension_numbers = #tpu.dot_dimension_numbers<[1], [0], [0], [1], [0, 0, 1, 1], [], []>} : vector<64x32xf32>, vector<32x32xf32>, vector<64x32xf32> -> vector<64x32xf32>
    %cst_40 = arith.constant dense<0.000000e+00> : vector<1x32xf32>
    %81 = tpu.matmul %3, %80, %cst_40 {dimension_numbers = #tpu.dot_dimension_numbers<[1], [0], [0], [1], [0, 0, 1, 1], [], []>} : vector<1x64xf32>, vector<64x32xf32>, vector<1x32xf32> -> vector<1x32xf32>
    %82 = arith.mulf %80, %80 : vector<64x32xf32>
    %cst_41 = arith.constant dense<0.000000e+00> : vector<1x32xf32>
    %83 = tpu.matmul %3, %82, %cst_41 {dimension_numbers = #tpu.dot_dimension_numbers<[1], [0], [0], [1], [0, 0, 1, 1], [], []>} : vector<1x64xf32>, vector<64x32xf32>, vector<1x32xf32> -> vector<1x32xf32>
    %cst_42 = arith.constant 1.562500e-02 : f32
    %84 = vector.broadcast %cst_42 : f32 to vector<1x32xf32>
    %85 = arith.mulf %81, %84 : vector<1x32xf32>
    %cst_43 = arith.constant 1.562500e-02 : f32
    %86 = vector.broadcast %cst_43 : f32 to vector<1x32xf32>
    %87 = arith.mulf %83, %86 : vector<1x32xf32>
    %88 = arith.mulf %85, %85 : vector<1x32xf32>
    %89 = arith.subf %87, %88 : vector<1x32xf32>
    %cst_44 = arith.constant 0.000000e+00 : f32
    %90 = vector.broadcast %cst_44 : f32 to vector<1x32xf32>
    %91 = arith.maximumf %89, %90 : vector<1x32xf32>
    %92 = vector.extract_strided_slice %2 {offsets = [6, 0], sizes = [1, 32], strides = [1, 1]} : vector<9x32xf32> to vector<1x32xf32>
    %93 = vector.extract_strided_slice %2 {offsets = [7, 0], sizes = [1, 32], strides = [1, 1]} : vector<9x32xf32> to vector<1x32xf32>
    %cst_45 = arith.constant 9.99999974E-6 : f32
    %94 = vector.broadcast %cst_45 : f32 to vector<1x32xf32>
    %95 = arith.addf %91, %94 : vector<1x32xf32>
    %96 = math.rsqrt %95 : vector<1x32xf32>
    %97 = arith.mulf %92, %96 : vector<1x32xf32>
    %98 = arith.mulf %85, %97 : vector<1x32xf32>
    %99 = arith.subf %93, %98 : vector<1x32xf32>
    %100 = vector.broadcast %97 : vector<1x32xf32> to vector<64x32xf32>
    %101 = arith.mulf %80, %100 : vector<64x32xf32>
    %102 = vector.broadcast %99 : vector<1x32xf32> to vector<64x32xf32>
    %103 = arith.addf %101, %102 : vector<64x32xf32>
    %cst_46 = arith.constant 0.000000e+00 : f32
    %104 = vector.broadcast %cst_46 : f32 to vector<64x32xf32>
    %105 = arith.maximumf %103, %104 : vector<64x32xf32>
    %c4 = arith.constant 4 : index
    %c0_47 = arith.constant 0 : index
    %c0_48 = arith.constant 0 : index
    %106 = vector.load %arg3[%c4, %c0_47, %c0_48] : memref<5x32x32xf32, #tpu.memory_space<vmem>>, vector<1x32x32xf32>
    %107 = vector.shape_cast %106 : vector<1x32x32xf32> to vector<32x32xf32>
    %108 = vector.extract_strided_slice %2 {offsets = [8, 0], sizes = [1, 32], strides = [1, 1]} : vector<9x32xf32> to vector<1x32xf32>
    %cst_49 = arith.constant dense<0.000000e+00> : vector<64x32xf32>
    %109 = tpu.matmul %105, %107, %cst_49 {dimension_numbers = #tpu.dot_dimension_numbers<[1], [0], [0], [1], [0, 0, 1, 1], [], []>} : vector<64x32xf32>, vector<32x32xf32>, vector<64x32xf32> -> vector<64x32xf32>
    %110 = vector.broadcast %108 : vector<1x32xf32> to vector<64x32xf32>
    %111 = arith.addf %109, %110 : vector<64x32xf32>
    %cst_50 = arith.constant 0.000000e+00 : f32
    %112 = vector.broadcast %cst_50 : f32 to vector<64x32xf32>
    %113 = arith.maximumf %111, %112 : vector<64x32xf32>
    %c0_51 = arith.constant 0 : index
    %c0_52 = arith.constant 0 : index
    %114 = vector.load %arg5[%c0_51, %c0_52] : memref<32x128xf32, #tpu.memory_space<vmem>>, vector<32x128xf32>
    %cst_53 = arith.constant dense<0.000000e+00> : vector<64x128xf32>
    %115 = tpu.matmul %113, %114, %cst_53 {dimension_numbers = #tpu.dot_dimension_numbers<[1], [0], [0], [1], [0, 0, 1, 1], [], []>} : vector<64x32xf32>, vector<32x128xf32>, vector<64x128xf32> -> vector<64x128xf32>
    %c0_54 = arith.constant 0 : index
    %c0_55 = arith.constant 0 : index
    %116 = vector.load %arg6[%c0_54, %c0_55] : memref<1x128xf32, #tpu.memory_space<vmem>>, vector<1x128xf32>
    %117 = vector.broadcast %116 : vector<1x128xf32> to vector<64x128xf32>
    %118 = arith.addf %115, %117 : vector<64x128xf32>
    %c0_56 = arith.constant 0 : index
    %c0_57 = arith.constant 0 : index
    %119 = vector.load %arg7[%c0_56, %c0_57] : memref<64x128xf32, #tpu.memory_space<vmem>>, vector<64x128xf32>
    tpu.vector_store %arg7[%c0_56, %c0_57], %118 {strides = array<i32>} : memref<64x128xf32, #tpu.memory_space<vmem>>, vector<64x128xf32>,
    return
  }
}

</mosaic_0001>

<bundles_post_ra>
// kernel: tpu_custom_call.1
= control target key start
LH: loop header
LB: loop body
LE: loop exit
PB: predicated region body
PF: predicated region fallthrough
CT: control target
= control target key end

     0   :  { %12 = vsyncpa [#allocation3], 0  ;;  %s3209_s0 = inlined_call_operand.vmem [shape: f32[64,64], index: 0, kind: input, shape index: {}]   ;;  %s3210_s1 = inlined_call_operand.vmem [shape: f32[64,16], index: 1, kind: input, shape index: {}]   ;;  %s3211_s2 = inlined_call_operand.vmem [shape: f32[16,32], index: 2, kind: input, shape index: {}]   ;;  %s3212_s3 = inlined_call_operand.hbm [shape: f32[5,32,32], index: 3, kind: input, shape index: {}]   ;;  %s3213_s4 = inlined_call_operand.hbm [shape: f32[9,32], index: 4, kind: input, shape index: {}]   ;;  %s3214_s5 = inlined_call_operand.hbm [shape: f32[32,128], index: 5, kind: input, shape index: {}]   ;;  %s3215_s6 = inlined_call_operand.vmem [shape: f32[1,128], index: 6, kind: input, shape index: {}]   ;;  %s3216_s7 = inlined_call_operand.hbm [shape: f32[64,128], index: 7, kind: output, shape index: {}]  }
   0x1   :  { %13 = vsyncpa [#allocation6], 0 }
   0x2   :  { %14 = vsyncpa [#allocation4], 0  ;;  %s2731_s24 = smov [#allocation5]   ;;  %s2732_s26 = smov [#allocation2]  }
   0x3   :  { %s38_s25 = sshll.u32 %s2731_s24, 4  ;;  %s26_s27 = sshll.u32 %s2732_s26, 4  ;;  %s39_s25 = int_to_ptr.vmem [resolvable:$true] %s38_s25  ;;  %s27_s27 = int_to_ptr.vmem [resolvable:$true] %s26_s27 }
   0x4   :  { %s2653_s28 = scalar_lea.vmem %s39_s25, 256  ;;  %p2658_p1 = scmp.lt.s32.totalorder %s39_s25, %s39_s25 }
   0x5   :  { %p2654_p0 = scmp.ne.s32.totalorder %s39_s25, %s2653_s28  ;;  %p2659_p2 = scmp.lt.s32.totalorder %s2653_s28, %s2653_s28 }
   0x7   :  { %p2660_p3 = por %p2659_p2, %p2658_p1 }
   0x9   :  { %p2661_p4 = pnand %p2660_p3, %p2654_p0 }
   0xb   :  { %2664 = shalt.err (!%p2661_p4)
}
   0xc   :  { %s2733_s29 = smov 128   ;;  %s2734_s30 = smov 8  }
   0xd   :  { %44 = dma.hbm_to_vmem [thread:$0]  %s3213_s4, 256, %s39_s25, [#allocation6], %s2733_s29, %s2733_s29, %s2734_s30  }
   0xe   :  { %s2673_s10 = scalar_lea.vmem %s27_s27, 2560  ;;  %p2678_p6 = scmp.lt.s32.totalorder %s27_s27, %s27_s27 }
   0xf   :  { %p2674_p5 = scmp.ne.s32.totalorder %s27_s27, %s2673_s10  ;;  %p2679_p7 = scmp.lt.s32.totalorder %s2673_s10, %s2673_s10 }
  0x11   :  { %p2680_p8 = por %p2679_p7, %p2678_p6 }
  0x13   :  { %p2681_p9 = pnand %p2680_p8, %p2674_p5 }
  0x15   :  { %2684 = shalt.err (!%p2681_p9)
}
  0x16   :  { %32 = dma.hbm_to_vmem [thread:$0]  %s3212_s3, 2560, %s27_s27, [#allocation3], %s2733_s29, %s2733_s29, %s2734_s30  }
  0x17   :  { %s2735_s13 = smov [#allocation7]  }
  0x18   :  { %s50_s14 = sshll.u32 %s2735_s13, 4  ;;  %s51_s14 = int_to_ptr.vmem [resolvable:$true] %s50_s14 }
  0x19   :  { %s2693_s15 = scalar_lea.vmem %s51_s14, 512  ;;  %p2698_p11 = scmp.lt.s32.totalorder %s51_s14, %s51_s14 }
  0x1a   :  { %p2694_p10 = scmp.ne.s32.totalorder %s51_s14, %s2693_s15  ;;  %p2699_p12 = scmp.lt.s32.totalorder %s2693_s15, %s2693_s15 }
  0x1c   :  { %p2700_p13 = por %p2699_p12, %p2698_p11 }
  0x1e   :  { %p2701_p0 = pnand %p2700_p13, %p2694_p10 }
  0x20   :  { %2704 = shalt.err (!%p2701_p0)
}
  0x21   :  { %56 = dma.hbm_to_vmem [thread:$0]  %s3214_s5, 512, %s51_s14, [#allocation6], %s2733_s29, %s2733_s29, %s2734_s30  }
  0x22   :  { %2725 = dma.done.wait [#allocation3], 2560  }
  0x23   :  { %2726 = vsyncadd [#allocation3], 4294964736 }
  0x24   :  { %2727 = dma.done.wait [#allocation6], 768  }
  0x25   :  { %2728 = vsyncadd [#allocation6], 4294966528  ;;  %v83_v0 = vld [vmem:[%s3210_s1 + $0x38] sm:$0xff]  ;;  %v82_v1 = vld [vmem:[%s3210_s1 + $0x30] sm:$0xff]  ;;  %vm86_vm0 = vcmask 523264   ;;  %vm218_vm1 = vcmask 130048   ;;  %v512_v58 = vlaneseq }
  0x26   :  { %2296 = vmatprep.subr.mxu0 %v83_v0  ;;  %v81_v2 = vld [vmem:[%s3210_s1 + $0x28] sm:$0xff]  ;;  %v2810_v3 = vld [vmem:[%s3209_s0] sm:$0xff]  ;;  %v79_v5 = vld [vmem:[%s3210_s1 + $0x18] sm:$0xff]  ;;  %v2736_v26 = vmov 0.0   ;;  %vm2737_vm2 = vmmov 0   ;;  %v2738_v43 = vmov 1.0  }
  0x27   :  { %2297 = vmatpush3.msra.mxu0 %v83_v0  ;;  %2312 = vmatprep.mubr.msk.f32.mxu0 %vm86_vm0, %v2810_v3  ;;  %v80_v4 = vld [vmem:[%s3210_s1 + $0x20] sm:$0xff]  ;;  %v78_v6 = vld [vmem:[%s3210_s1 + $0x10] sm:$0xff]  ;;  %v77_v7 = vld [vmem:[%s3210_s1 + $0x8] sm:$0xff]  ;;  %v2948_v59 = vshrl.u32 %v512_v58, 7  ;;  %vm552_vm3 = vcmask 261120   ;;  %s2739_s26 = smov [#allocation8]  }
  0x28   :  { %2298 = vmatprep.subr.mxu0 %v82_v1  ;;  %v76_v8 = vld [vmem:[%s3210_s1] sm:$0xff]  ;;  %v2832_v9 = vld [vmem:[%s3209_s0 + $0x8] sm:$0xff]  ;;  %v2837_v10 = vld [vmem:[%s3209_s0 + $0x10] sm:$0xff] }
  0x29   :  { %2299 = vmatpush3.msra.mxu0 %v82_v1  ;;  %v2846_v11 = vld [vmem:[%s3209_s0 + $0x18] sm:$0xff]  ;;  %v2851_v12 = vld [vmem:[%s3209_s0 + $0x20] sm:$0xff]  ;;  %v2860_v13 = vld [vmem:[%s3209_s0 + $0x28] sm:$0xff]  ;;  %v514_v63 = vsub.s32 0, %v2948_v59 }
  0x2a   :  { %2300 = vmatprep.subr.mxu0 %v81_v2  ;;  %v2865_v14 = vld [vmem:[%s3209_s0 + $0x30] sm:$0xff]  ;;  %v2874_v15 = vld [vmem:[%s3209_s0 + $0x38] sm:$0xff]  ;;  %v217_v16 = vld [vmem:[%s3211_s2 + $0x8] sm:$0xff] }
  0x2b   :  { %2301 = vmatpush3.msra.mxu0 %v81_v2  ;;  %2324 = vmatprep.subr.mxu1 %v217_v16  ;;  %v216_v17 = vld [vmem:[%s3211_s2] sm:$0xff]  ;;  %v547_v44 = vld [vmem:[#allocation2 + $0x18] sm:$0xff]  ;;  %v546_v45 = vld [vmem:[#allocation2 + $0x10] sm:$0xff] }
  0x2c   :  { %2302 = vmatprep.subr.mxu0 %v80_v4  ;;  %2325 = vmatpush3.msra.mxu1 %v217_v16  ;;  %v545_v46 = vld [vmem:[#allocation2 + $0x8] sm:$0xff]  ;;  %v544_v47 = vld [vmem:[#allocation2] sm:$0xff] }
  0x2d   :  { %2303 = vmatpush3.msra.mxu0 %v80_v4  ;;  %2326 = vmatprep.subr.mxu1 %v216_v17  ;;  %v2950_v60 = vld [vmem:[#allocation5] sm:$0xff]  ;;  %v526_v4 = vsub.s32 1, %v2948_v59 }
  0x2e   :  { %2304 = vmatprep.subr.mxu0 %v79_v5  ;;  %2327 = vmatpush3.msra.mxu1 %v216_v17 }
  0x2f   :  { %2305 = vmatpush3.msra.mxu0 %v79_v5  ;;  %2340 = vmatprep.subr.mxu1 %v2736_v26 }
  0x30   :  { %2306 = vmatprep.subr.mxu0 %v78_v6 }
  0x31   :  { %2307 = vmatpush3.msra.mxu0 %v78_v6 }
  0x32   :  { %2308 = vmatprep.subr.mxu0 %v77_v7 }
  0x33   :  { %2309 = vmatpush3.msra.mxu0 %v77_v7 }
  0x34   :  { %2310 = vmatprep.subr.mxu0 %v76_v8 }
  0x35   :  { %2311 = vmatpush3.msra.mxu0 %v76_v8 }
  0x36   :  { %2313 = vmatmul.mubr.msk.f32.vlgmr.msra.gmra.mxu0 %vm86_vm0, %v2832_v9  ;;  %2359 = vmatprep.subr.mxu0 %v2736_v26 }
  0x37   :  { %2315 = vmatprep.mubr.msk.f32.mxu0 %vm86_vm0, %v2837_v10 }
  0x3a   :  { %2316 = vmatmul.mubr.msk.f32.gmra.mxu0 %vm86_vm0, %v2846_v11 }
  0x3b   :  { %2318 = vmatprep.mubr.msk.f32.mxu0 %vm86_vm0, %v2851_v12 }
  0x3e   :  { %2319 = vmatmul.mubr.msk.f32.gmra.mxu0 %vm86_vm0, %v2860_v13 }
  0x3f   :  { %2321 = vmatprep.mubr.msk.f32.mxu0 %vm86_vm0, %v2865_v14 }
  0x42   :  { %2322 = vmatmul.mubr.msk.f32.gmra.mxu0 %vm86_vm0, %v2874_v15 }
  0x43   :  { %2375 = vmatprep.mubr.msk.f32.mxu0 %vm2737_vm2, %v2736_v26 }
  0xf6   :  { %v2314_v18 = vpop.f32.mrf.mxu0 }
  0xf8   :  { %v177_v19 = vpop.f32.mrf.mxu0 }
  0xf9   :  { %2328 = vmatprep.mubr.msk.f32.mxu1 %vm218_vm1, %v177_v19 }
  0xfa   :  { %v2317_v20 = vpop.f32.mrf.mxu0  ;;  %2329 = vmatmul.mubr.msk.f32.vlgmr.msra.gmra.mxu1 %vm218_vm1, %v2314_v18 }
  0xfc   :  { %v187_v21 = vpop.f32.mrf.mxu0 }
  0xfd   :  { %2331 = vmatprep.mubr.msk.f32.mxu1 %vm218_vm1, %v187_v21 }
  0xfe   :  { %v2320_v22 = vpop.f32.mrf.mxu0  ;;  %2332 = vmatmul.mubr.msk.f32.gmra.mxu1 %vm218_vm1, %v2317_v20 }
 0x100   :  { %v197_v23 = vpop.f32.mrf.mxu0 }
 0x101   :  { %2334 = vmatprep.mubr.msk.f32.mxu1 %vm218_vm1, %v197_v23 }
 0x102   :  { %v2323_v24 = vpop.f32.mrf.mxu0  ;;  %2335 = vmatmul.mubr.msk.f32.gmra.mxu1 %vm218_vm1, %v2320_v22 }
 0x104   :  { %v207_v25 = vpop.f32.mrf.mxu0 }
 0x105   :  { %2337 = vmatprep.mubr.msk.f32.mxu1 %vm218_vm1, %v207_v25 }
 0x106   :  { %2338 = vmatmul.mubr.msk.f32.gmra.mxu1 %vm218_vm1, %v2323_v24 }
 0x107   :  { %2356 = vmatprep.mubr.msk.f32.mxu1 %vm2737_vm2, %v2736_v26 }
 0x1ba   :  { %v2890_v27 = vpop.f32.mrf.mxu1 }
 0x1bb   :  { %v422_v41 = vmul.f32 %v2890_v27, %v2890_v27 }
 0x1bc   :  { %v2892_v28 = vpop.f32.mrf.mxu1 }
 0x1bd   :  { %v421_v42 = vmul.f32 %v2892_v28, %v2892_v28 }
 0x1be   :  { %v2894_v29 = vpop.f32.mrf.mxu1 }
 0x1bf   :  { %v424_v39 = vmul.f32 %v2894_v29, %v2894_v29 }
 0x1c0   :  { %v2896_v30 = vpop.f32.mrf.mxu1 }
 0x1c1   :  { %v423_v40 = vmul.f32 %v2896_v30, %v2896_v30 }
 0x1c2   :  { %v2898_v31 = vpop.f32.mrf.mxu1 }
 0x1c3   :  { %v426_v37 = vmul.f32 %v2898_v31, %v2898_v31 }
 0x1c4   :  { %v2900_v32 = vpop.f32.mrf.mxu1 }
 0x1c5   :  { %v425_v38 = vmul.f32 %v2900_v32, %v2900_v32 }
 0x1c6   :  { %v2902_v33 = vpop.f32.mrf.mxu1 }
 0x1c7   :  { %v428_v34 = vmul.f32 %v2902_v33, %v2902_v33  ;;  %2341 = vmatpush3.msra.mxu1 %v2902_v33 }
 0x1c8   :  { %v2907_v35 = vpop.f32.mrf.mxu1  ;;  %2342 = vmatprep.subr.mxu1 %v2736_v26 }
 0x1c9   :  { %v427_v36 = vmul.f32 %v2907_v35, %v2907_v35  ;;  %2343 = vmatpush3.msra.mxu1 %v2907_v35  ;;  %2360 = vmatpush3.msra.mxu0 %v428_v34 }
 0x1ca   :  { %2344 = vmatprep.subr.mxu1 %v2736_v26  ;;  %2361 = vmatprep.subr.mxu0 %v2736_v26 }
 0x1cb   :  { %2345 = vmatpush3.msra.mxu1 %v2898_v31  ;;  %2362 = vmatpush3.msra.mxu0 %v427_v36 }
 0x1cc   :  { %2346 = vmatprep.subr.mxu1 %v2736_v26  ;;  %2363 = vmatprep.subr.mxu0 %v2736_v26 }
 0x1cd   :  { %2347 = vmatpush3.msra.mxu1 %v2900_v32  ;;  %2364 = vmatpush3.msra.mxu0 %v426_v37 }
 0x1ce   :  { %2348 = vmatprep.subr.mxu1 %v2736_v26  ;;  %2365 = vmatprep.subr.mxu0 %v2736_v26 }
 0x1cf   :  { %2349 = vmatpush3.msra.mxu1 %v2894_v29  ;;  %2366 = vmatpush3.msra.mxu0 %v425_v38 }
 0x1d0   :  { %2350 = vmatprep.subr.mxu1 %v2736_v26  ;;  %2367 = vmatprep.subr.mxu0 %v2736_v26 }
 0x1d1   :  { %2351 = vmatpush3.msra.mxu1 %v2896_v30  ;;  %2368 = vmatpush3.msra.mxu0 %v424_v39 }
 0x1d2   :  { %2352 = vmatprep.subr.mxu1 %v2736_v26  ;;  %2369 = vmatprep.subr.mxu0 %v2736_v26 }
 0x1d3   :  { %2353 = vmatpush3.msra.mxu1 %v2890_v27  ;;  %2370 = vmatpush3.msra.mxu0 %v423_v40 }
 0x1d4   :  { %2354 = vmatprep.subr.mxu1 %v2736_v26  ;;  %2371 = vmatprep.subr.mxu0 %v2736_v26 }
 0x1d5   :  { %2355 = vmatpush3.msra.mxu1 %v2892_v28  ;;  %2372 = vmatpush3.msra.mxu0 %v422_v41  ;;  %v798_v41 = vld [vmem:[#allocation2 + $0x30] sm:$0xff] }
 0x1d6   :  { %2357 = vmatmul.mubr.msk.f32.vlgmr.msra.gmra.mxu1 %vm86_vm0, %v2738_v43  ;;  %2373 = vmatprep.subr.mxu0 %v2736_v26 }
 0x1d7   :  { %2374 = vmatpush3.msra.mxu0 %v421_v42  ;;  %2378 = vmatprep.subr.mxu1 %v547_v44 }
 0x1d8   :  { %2376 = vmatmul.mubr.msk.f32.vlgmr.msra.gmra.mxu0 %vm86_vm0, %v2738_v43  ;;  %2379 = vmatpush3.msra.mxu1 %v547_v44 }
 0x1d9   :  { %2380 = vmatprep.subr.mxu1 %v546_v45 }
 0x1da   :  { %2381 = vmatpush3.msra.mxu1 %v546_v45 }
 0x1db   :  { %2382 = vmatprep.subr.mxu1 %v545_v46 }
 0x1dc   :  { %2383 = vmatpush3.msra.mxu1 %v545_v46  ;;  %v550_v46 = vsub.s32 2, %v2948_v59 }
 0x1dd   :  { %2384 = vmatprep.subr.mxu1 %v544_v47 }
 0x1de   :  { %2385 = vmatpush3.msra.mxu1 %v544_v47 }
 0x296   :  { %v417_v48 = vpop.f32.mrf.mxu1 }
 0x297   :  { %v499_v49 = vmul.f32 0.015625, %v417_v48 }
 0x298   :  { %v2358_v50 = vpop.f32.mrf.mxu1  ;;  %v495_v51 = vpop.f32.mrf.mxu0 }
 0x299   :  { %v501_v52 = vmul.f32 %v499_v49, %v499_v49  ;;  %v500_v53 = vmul.f32 0.015625, %v495_v51 }
 0x29a   :  { %v2377_v54 = vpop.f32.mrf.mxu0 }
 0x29b   :  { %v502_v55 = vsub.f32 %v500_v53, %v501_v52 }
 0x29d   :  { %v503_v56 = vmax.f32 %v502_v55, 0.0 }
 0x29f   :  { %v504_v57 = vadd.f32 1e-05, %v503_v56 }
 0x2a1   :  { %2639 = vrsqrt.f32 %v504_v57 }
 0x2ae   :  { %v2640_v61 = vpop.eup %2639 }
 0x2af   :  { %v506_v62 = vmul.f32 %v2640_v61, %v2950_v60 }
 0x2b1   :  { %v507_v0 = vmul.f32 %v506_v62, %v499_v49  ;;  %v515_v2 = vrot.slane %v506_v62, %v514_v63  ;;  %v551_v49 = vrot.slane %v2950_v60, %v550_v46 }
 0x2b3   :  { %v509_v1 = vrot.slane %v507_v0, 7  ;;  %v516_v7 = vmul.f32 %v515_v2, %v2892_v28  ;;  %v517_v8 = vmul.f32 %v2890_v27, %v515_v2  ;;  %v518_v16 = vmul.f32 %v515_v2, %v2896_v30 }
 0x2b4   :  { %v519_v20 = vmul.f32 %v2894_v29, %v515_v2  ;;  %v520_v23 = vmul.f32 %v515_v2, %v2900_v32  ;;  %v521_v27 = vmul.f32 %v2898_v31, %v515_v2  ;;  %v522_v28 = vmul.f32 %v515_v2, %v2907_v35  ;;  %v799_v35 = vld [vmem:[#allocation2 + $0x38] sm:$0xff] }
 0x2b5   :  { %v511_v5 = vsub.f32 %v2950_v60, %v509_v1  ;;  %v523_v32 = vmul.f32 %v2902_v33, %v515_v2  ;;  %2426 = vmatprep.subr.mxu0 %v799_v35 }
 0x2b6   :  { %2427 = vmatpush3.msra.mxu0 %v799_v35 }
 0x2b7   :  { %v527_v6 = vrot.slane %v511_v5, %v526_v4  ;;  %2428 = vmatprep.subr.mxu0 %v798_v41 }
 0x2b8   :  { %2429 = vmatpush3.msra.mxu0 %v798_v41 }
 0x2b9   :  { %v528_v17 = vadd.f32 %v527_v6, %v516_v7  ;;  %v529_v18 = vadd.f32 %v527_v6, %v517_v8  ;;  %v530_v19 = vadd.f32 %v527_v6, %v518_v16  ;;  %v531_v24 = vadd.f32 %v527_v6, %v519_v20  ;;  %v797_v7 = vld [vmem:[#allocation2 + $0x28] sm:$0xff]  ;;  %v796_v8 = vld [vmem:[#allocation2 + $0x20] sm:$0xff] }
 0x2ba   :  { %v532_v34 = vadd.f32 %v527_v6, %v520_v23  ;;  %v533_v36 = vadd.f32 %v527_v6, %v521_v27  ;;  %v534_v37 = vadd.f32 %v527_v6, %v522_v28  ;;  %v535_v39 = vadd.f32 %v527_v6, %v523_v32  ;;  %2430 = vmatprep.subr.mxu0 %v797_v7 }
 0x2bb   :  { %v536_v21 = vmax.f32 %v528_v17, 0.0  ;;  %v537_v22 = vmax.f32 %v529_v18, 0.0  ;;  %v538_v25 = vmax.f32 %v530_v19, 0.0  ;;  %v539_v30 = vmax.f32 %v531_v24, 0.0  ;;  %2431 = vmatpush3.msra.mxu0 %v797_v7 }
 0x2bc   :  { %v540_v29 = vmax.f32 %v532_v34, 0.0  ;;  %v541_v38 = vmax.f32 %v533_v36, 0.0  ;;  %v542_v40 = vmax.f32 %v534_v37, 0.0  ;;  %v543_v31 = vmax.f32 %v535_v39, 0.0  ;;  %2432 = vmatprep.subr.mxu0 %v796_v8 }
 0x2bd   :  { %2386 = vmatprep.mubr.msk.f32.mxu1 %vm552_vm3, %v536_v21  ;;  %2433 = vmatpush3.msra.mxu0 %v796_v8 }
 0x2be   :  { %2387 = vmatmul.mubr.msk.f32.vlgmr.msra.gmra.mxu1 %vm552_vm3, %v537_v22  ;;  %2446 = vmatprep.subr.mxu0 %v2736_v26 }
 0x2bf   :  { %2389 = vmatprep.mubr.msk.f32.mxu1 %vm552_vm3, %v538_v25 }
 0x2c2   :  { %2390 = vmatmul.mubr.msk.f32.gmra.mxu1 %vm552_vm3, %v539_v30 }
 0x2c3   :  { %2392 = vmatprep.mubr.msk.f32.mxu1 %vm552_vm3, %v540_v29 }
 0x2c6   :  { %2393 = vmatmul.mubr.msk.f32.gmra.mxu1 %vm552_vm3, %v541_v38 }
 0x2c7   :  { %2395 = vmatprep.mubr.msk.f32.mxu1 %vm552_vm3, %v542_v40 }
 0x2ca   :  { %2396 = vmatmul.mubr.msk.f32.gmra.mxu1 %vm552_vm3, %v543_v31 }
 0x2cb   :  { %2414 = vmatprep.mubr.msk.f32.mxu1 %vm86_vm0, %v2810_v3 }
 0x37e   :  { %v2388_v33 = vpop.f32.mrf.mxu1 }
 0x37f   :  { %v649_v0 = vadd.f32 %v2388_v33, %v551_v49  ;;  %v1132_v33 = vld [vmem:[#allocation2 + $0x58] sm:$0xff] }
 0x380   :  { %v643_v42 = vpop.f32.mrf.mxu1 }
 0x381   :  { %v644_v2 = vadd.f32 %v643_v42, %v551_v49  ;;  %v683_v5 = vmax.f32 %v649_v0, 0.0  ;;  %v1131_v42 = vld [vmem:[#allocation2 + $0x50] sm:$0xff] }
 0x382   :  { %v2391_v44 = vpop.f32.mrf.mxu1 }
 0x383   :  { %v659_v58 = vadd.f32 %v2391_v44, %v551_v49  ;;  %v682_v6 = vmax.f32 %v644_v2, 0.0  ;;  %v1130_v44 = vld [vmem:[#allocation2 + $0x48] sm:$0xff] }
 0x384   :  { %v653_v45 = vpop.f32.mrf.mxu1 }
 0x385   :  { %v654_v62 = vadd.f32 %v653_v45, %v551_v49  ;;  %v685_v1 = vmax.f32 %v659_v58, 0.0  ;;  %v1129_v45 = vld [vmem:[#allocation2 + $0x40] sm:$0xff] }
 0x386   :  { %v2394_v47 = vpop.f32.mrf.mxu1 }
 0x387   :  { %v669_v53 = vadd.f32 %v2394_v47, %v551_v49  ;;  %v684_v4 = vmax.f32 %v654_v62, 0.0 }
 0x388   :  { %v663_v48 = vpop.f32.mrf.mxu1 }
 0x389   :  { %v664_v56 = vadd.f32 %v663_v48, %v551_v49  ;;  %v687_v61 = vmax.f32 %v669_v53, 0.0 }
 0x38a   :  { %v2397_v50 = vpop.f32.mrf.mxu1 }
 0x38b   :  { %v679_v51 = vadd.f32 %v2397_v50, %v551_v49  ;;  %v686_v63 = vmax.f32 %v664_v56, 0.0 }
 0x38c   :  { %v673_v52 = vpop.f32.mrf.mxu1 }
 0x38d   :  { %v689_v54 = vmax.f32 %v679_v51, 0.0  ;;  %v674_v55 = vadd.f32 %v673_v52, %v551_v49 }
 0x38f   :  { %v688_v57 = vmax.f32 %v674_v55, 0.0  ;;  %2398 = vmatprep.subr.mxu1 %v689_v54 }
 0x390   :  { %2399 = vmatpush3.msra.mxu1 %v689_v54 }
 0x391   :  { %2400 = vmatprep.subr.mxu1 %v688_v57 }
 0x392   :  { %2401 = vmatpush3.msra.mxu1 %v688_v57 }
 0x393   :  { %2402 = vmatprep.subr.mxu1 %v687_v61 }
 0x394   :  { %2403 = vmatpush3.msra.mxu1 %v687_v61  ;;  %v1098_v61 = vsub.s32 3, %v2948_v59 }
 0x395   :  { %2404 = vmatprep.subr.mxu1 %v686_v63 }
 0x396   :  { %2405 = vmatpush3.msra.mxu1 %v686_v63 }
 0x397   :  { %2406 = vmatprep.subr.mxu1 %v685_v1 }
 0x398   :  { %2407 = vmatpush3.msra.mxu1 %v685_v1  ;;  %v1110_v1 = vsub.s32 4, %v2948_v59 }
 0x399   :  { %2408 = vmatprep.subr.mxu1 %v684_v4 }
 0x39a   :  { %2409 = vmatpush3.msra.mxu1 %v684_v4 }
 0x39b   :  { %2410 = vmatprep.subr.mxu1 %v683_v5 }
 0x39c   :  { %2411 = vmatpush3.msra.mxu1 %v683_v5 }
 0x39d   :  { %2412 = vmatprep.subr.mxu1 %v682_v6 }
 0x39e   :  { %2413 = vmatpush3.msra.mxu1 %v682_v6 }
 0x39f   :  { %2415 = vmatmul.mubr.msk.f32.vlgmr.msra.gmra.mxu1 %vm86_vm0, %v2832_v9  ;;  %2465 = vmatprep.subr.mxu1 %v2736_v26 }
 0x3a0   :  { %2417 = vmatprep.mubr.msk.f32.mxu1 %vm86_vm0, %v2837_v10 }
 0x3a3   :  { %2418 = vmatmul.mubr.msk.f32.gmra.mxu1 %vm86_vm0, %v2846_v11 }
 0x3a4   :  { %2420 = vmatprep.mubr.msk.f32.mxu1 %vm86_vm0, %v2851_v12 }
 0x3a7   :  { %2421 = vmatmul.mubr.msk.f32.gmra.mxu1 %vm86_vm0, %v2860_v13 }
 0x3a8   :  { %2423 = vmatprep.mubr.msk.f32.mxu1 %vm86_vm0, %v2865_v14 }
 0x3ab   :  { %2424 = vmatmul.mubr.msk.f32.gmra.mxu1 %vm86_vm0, %v2874_v15 }
 0x3ac   :  { %2481 = vmatprep.mubr.msk.f32.mxu1 %vm2737_vm2, %v2736_v26 }
 0x45f   :  { %v2416_v16 = vpop.f32.mrf.mxu1 }
 0x461   :  { %v756_v17 = vpop.f32.mrf.mxu1 }
 0x462   :  { %2434 = vmatprep.mubr.msk.f32.mxu0 %vm552_vm3, %v756_v17 }
 0x463   :  { %v2419_v18 = vpop.f32.mrf.mxu1  ;;  %2435 = vmatmul.mubr.msk.f32.vlgmr.msra.gmra.mxu0 %vm552_vm3, %v2416_v16 }
 0x465   :  { %v766_v19 = vpop.f32.mrf.mxu1 }
 0x466   :  { %2437 = vmatprep.mubr.msk.f32.mxu0 %vm552_vm3, %v766_v19 }
 0x467   :  { %v2422_v20 = vpop.f32.mrf.mxu1  ;;  %2438 = vmatmul.mubr.msk.f32.gmra.mxu0 %vm552_vm3, %v2419_v18 }
 0x469   :  { %v776_v21 = vpop.f32.mrf.mxu1 }
 0x46a   :  { %2440 = vmatprep.mubr.msk.f32.mxu0 %vm552_vm3, %v776_v21 }
 0x46b   :  { %v2425_v22 = vpop.f32.mrf.mxu1  ;;  %2441 = vmatmul.mubr.msk.f32.gmra.mxu0 %vm552_vm3, %v2422_v20 }
 0x46d   :  { %v786_v23 = vpop.f32.mrf.mxu1 }
 0x46e   :  { %2443 = vmatprep.mubr.msk.f32.mxu0 %vm552_vm3, %v786_v23 }
 0x46f   :  { %2444 = vmatmul.mubr.msk.f32.gmra.mxu0 %vm552_vm3, %v2425_v22 }
 0x470   :  { %2462 = vmatprep.mubr.msk.f32.mxu0 %vm2737_vm2, %v2736_v26 }
 0x523   :  { %v3004_v24 = vpop.f32.mrf.mxu0 }
 0x524   :  { %v1000_v35 = vmul.f32 %v3004_v24, %v3004_v24 }
 0x525   :  { %v3006_v25 = vpop.f32.mrf.mxu0 }
 0x526   :  { %v999_v41 = vmul.f32 %v3006_v25, %v3006_v25 }
 0x527   :  { %v3008_v34 = vpop.f32.mrf.mxu0 }
 0x528   :  { %v1002_v40 = vmul.f32 %v3008_v34, %v3008_v34 }
 0x529   :  { %v3010_v27 = vpop.f32.mrf.mxu0 }
 0x52a   :  { %v1001_v31 = vmul.f32 %v3010_v27, %v3010_v27 }
 0x52b   :  { %v3012_v28 = vpop.f32.mrf.mxu0 }
 0x52c   :  { %v1004_v38 = vmul.f32 %v3012_v28, %v3012_v28 }
 0x52d   :  { %v3014_v30 = vpop.f32.mrf.mxu0 }
 0x52e   :  { %v1003_v39 = vmul.f32 %v3014_v30, %v3014_v30 }
 0x52f   :  { %v3016_v36 = vpop.f32.mrf.mxu0 }
 0x530   :  { %v1006_v29 = vmul.f32 %v3016_v36, %v3016_v36  ;;  %2447 = vmatpush3.msra.mxu0 %v3016_v36 }
 0x531   :  { %v3021_v37 = vpop.f32.mrf.mxu0  ;;  %2448 = vmatprep.subr.mxu0 %v2736_v26 }
 0x532   :  { %v1005_v32 = vmul.f32 %v3021_v37, %v3021_v37  ;;  %2449 = vmatpush3.msra.mxu0 %v3021_v37  ;;  %2466 = vmatpush3.msra.mxu1 %v1006_v29 }
 0x533   :  { %2450 = vmatprep.subr.mxu0 %v2736_v26  ;;  %2467 = vmatprep.subr.mxu1 %v2736_v26 }
 0x534   :  { %2451 = vmatpush3.msra.mxu0 %v3012_v28  ;;  %2468 = vmatpush3.msra.mxu1 %v1005_v32 }
 0x535   :  { %2452 = vmatprep.subr.mxu0 %v2736_v26  ;;  %2469 = vmatprep.subr.mxu1 %v2736_v26 }
 0x536   :  { %2453 = vmatpush3.msra.mxu0 %v3014_v30  ;;  %2470 = vmatpush3.msra.mxu1 %v1004_v38 }
 0x537   :  { %2454 = vmatprep.subr.mxu0 %v2736_v26  ;;  %2471 = vmatprep.subr.mxu1 %v2736_v26 }
 0x538   :  { %2455 = vmatpush3.msra.mxu0 %v3008_v34  ;;  %2472 = vmatpush3.msra.mxu1 %v1003_v39 }
 0x539   :  { %2456 = vmatprep.subr.mxu0 %v2736_v26  ;;  %2473 = vmatprep.subr.mxu1 %v2736_v26 }
 0x53a   :  { %2457 = vmatpush3.msra.mxu0 %v3010_v27  ;;  %2474 = vmatpush3.msra.mxu1 %v1002_v40 }
 0x53b   :  { %2458 = vmatprep.subr.mxu0 %v2736_v26  ;;  %2475 = vmatprep.subr.mxu1 %v2736_v26 }
 0x53c   :  { %2459 = vmatpush3.msra.mxu0 %v3004_v24  ;;  %2476 = vmatpush3.msra.mxu1 %v1001_v31 }
 0x53d   :  { %2460 = vmatprep.subr.mxu0 %v2736_v26  ;;  %2477 = vmatprep.subr.mxu1 %v2736_v26 }
 0x53e   :  { %2461 = vmatpush3.msra.mxu0 %v3006_v25  ;;  %2478 = vmatpush3.msra.mxu1 %v1000_v35  ;;  %v1382_v35 = vld [vmem:[#allocation2 + $0x70] sm:$0xff] }
 0x53f   :  { %2463 = vmatmul.mubr.msk.f32.vlgmr.msra.gmra.mxu0 %vm86_vm0, %v2738_v43  ;;  %2479 = vmatprep.subr.mxu1 %v2736_v26 }
 0x540   :  { %2480 = vmatpush3.msra.mxu1 %v999_v41  ;;  %2484 = vmatprep.subr.mxu0 %v1132_v33  ;;  %v1381_v41 = vld [vmem:[#allocation2 + $0x68] sm:$0xff] }
 0x541   :  { %2482 = vmatmul.mubr.msk.f32.vlgmr.msra.gmra.mxu1 %vm86_vm0, %v2738_v43  ;;  %2485 = vmatpush3.msra.mxu0 %v1132_v33 }
 0x542   :  { %2520 = vmatprep.mubr.msk.f32.mxu1 %vm86_vm0, %v2810_v3  ;;  %2486 = vmatprep.subr.mxu0 %v1131_v42 }
 0x543   :  { %2487 = vmatpush3.msra.mxu0 %v1131_v42 }
 0x544   :  { %2488 = vmatprep.subr.mxu0 %v1130_v44 }
 0x545   :  { %2489 = vmatpush3.msra.mxu0 %v1130_v44 }
 0x546   :  { %2490 = vmatprep.subr.mxu0 %v1129_v45 }
 0x547   :  { %2491 = vmatpush3.msra.mxu0 %v1129_v45  ;;  %v1135_v45 = vsub.s32 5, %v2948_v59 }
 0x5ff   :  { %v995_v46 = vpop.f32.mrf.mxu0 }
 0x600   :  { %v1077_v47 = vmul.f32 0.015625, %v995_v46 }
 0x601   :  { %v2464_v48 = vpop.f32.mrf.mxu0  ;;  %v1073_v49 = vpop.f32.mrf.mxu1 }
 0x602   :  { %v1079_v50 = vmul.f32 %v1077_v47, %v1077_v47  ;;  %v1078_v51 = vmul.f32 0.015625, %v1073_v49  ;;  %v1136_v48 = vrot.slane %v2950_v60, %v1135_v45 }
 0x603   :  { %v2483_v52 = vpop.f32.mrf.mxu1 }
 0x604   :  { %v1080_v3 = vsub.f32 %v1078_v51, %v1079_v50 }
 0x606   :  { %v1081_v53 = vmax.f32 %v1080_v3, 0.0 }
 0x608   :  { %v1082_v54 = vadd.f32 1e-05, %v1081_v53 }
 0x60a   :  { %2641 = vrsqrt.f32 %v1082_v54 }
 0x617   :  { %v2642_v55 = vpop.eup %2641 }
 0x618   :  { %v1085_v56 = vrot.slane %v2642_v55, 5 }
 0x61a   :  { %v1087_v57 = vmul.f32 %v1085_v56, %v2950_v60 }
 0x61c   :  { %v1089_v58 = vrot.slane %v1087_v57, 3  ;;  %v1099_v0 = vrot.slane %v1087_v57, %v1098_v61 }
 0x61e   :  { %v1091_v62 = vmul.f32 %v1089_v58, %v1077_v47  ;;  %v1100_v5 = vmul.f32 %v1099_v0, %v3006_v25  ;;  %v1101_v6 = vmul.f32 %v3004_v24, %v1099_v0  ;;  %v1102_v7 = vmul.f32 %v1099_v0, %v3010_v27 }
 0x61f   :  { %v1103_v18 = vmul.f32 %v3008_v34, %v1099_v0  ;;  %v1104_v21 = vmul.f32 %v1099_v0, %v3014_v30  ;;  %v1105_v24 = vmul.f32 %v3012_v28, %v1099_v0  ;;  %v1106_v25 = vmul.f32 %v1099_v0, %v3021_v37  ;;  %v1383_v37 = vld [vmem:[#allocation2 + $0x78] sm:$0xff] }
 0x620   :  { %v1093_v63 = vrot.slane %v1091_v62, 4  ;;  %v1107_v30 = vmul.f32 %v3016_v36, %v1099_v0  ;;  %2532 = vmatprep.subr.mxu0 %v1383_v37 }
 0x622   :  { %v1095_v2 = vsub.f32 %v2950_v60, %v1093_v63 }
 0x624   :  { %v1111_v4 = vrot.slane %v1095_v2, %v1110_v1 }
 0x626   :  { %v1112_v8 = vadd.f32 %v1111_v4, %v1100_v5  ;;  %v1113_v16 = vadd.f32 %v1111_v4, %v1101_v6  ;;  %v1114_v17 = vadd.f32 %v1111_v4, %v1102_v7  ;;  %v1115_v22 = vadd.f32 %v1111_v4, %v1103_v18 }
 0x627   :  { %v1116_v29 = vadd.f32 %v1111_v4, %v1104_v21  ;;  %v1117_v32 = vadd.f32 %v1111_v4, %v1105_v24  ;;  %v1118_v38 = vadd.f32 %v1111_v4, %v1106_v25  ;;  %v1119_v40 = vadd.f32 %v1111_v4, %v1107_v30  ;;  %v1715_v30 = vld [vmem:[#allocation2 + $0x90] sm:$0xff] }
 0x628   :  { %v1120_v19 = vmax.f32 %v1112_v8, 0.0  ;;  %v1121_v20 = vmax.f32 %v1113_v16, 0.0  ;;  %v1122_v23 = vmax.f32 %v1114_v17, 0.0  ;;  %v1123_v27 = vmax.f32 %v1115_v22, 0.0 }
 0x629   :  { %v1124_v34 = vmax.f32 %v1116_v29, 0.0  ;;  %v1125_v39 = vmax.f32 %v1117_v32, 0.0  ;;  %v1126_v31 = vmax.f32 %v1118_v38, 0.0  ;;  %v1127_v28 = vmax.f32 %v1119_v40, 0.0  ;;  %v1716_v38 = vld [vmem:[#allocation2 + $0x98] sm:$0xff]  ;;  %v1713_v40 = vld [vmem:[#allocation2 + $0x80] sm:$0xff] }
 0x62a   :  { %2492 = vmatprep.mubr.msk.f32.mxu0 %vm552_vm3, %v1120_v19 }
 0x62b   :  { %2493 = vmatmul.mubr.msk.f32.vlgmr.msra.gmra.mxu0 %vm552_vm3, %v1121_v20 }
 0x62c   :  { %2495 = vmatprep.mubr.msk.f32.mxu0 %vm552_vm3, %v1122_v23  ;;  %2533 = vmatpush3.msra.mxu0 %v1383_v37 }
 0x62d   :  { %2534 = vmatprep.subr.mxu0 %v1382_v35 }
 0x62e   :  { %2535 = vmatpush3.msra.mxu0 %v1382_v35 }
 0x62f   :  { %2496 = vmatmul.mubr.msk.f32.gmra.mxu0 %vm552_vm3, %v1123_v27  ;;  %2536 = vmatprep.subr.mxu0 %v1381_v41 }
 0x630   :  { %2498 = vmatprep.mubr.msk.f32.mxu0 %vm552_vm3, %v1124_v34  ;;  %2537 = vmatpush3.msra.mxu0 %v1381_v41 }
 0x633   :  { %2499 = vmatmul.mubr.msk.f32.gmra.mxu0 %vm552_vm3, %v1125_v39  ;;  %v1714_v39 = vld [vmem:[#allocation2 + $0x88] sm:$0xff] }
 0x634   :  { %2501 = vmatprep.mubr.msk.f32.mxu0 %vm552_vm3, %v1126_v31 }
 0x637   :  { %2502 = vmatmul.mubr.msk.f32.gmra.mxu0 %vm552_vm3, %v1127_v28 }
 0x6eb   :  { %v2494_v36 = vpop.f32.mrf.mxu0 }
 0x6ec   :  { %v1233_v62 = vadd.f32 %v2494_v36, %v1136_v48 }
 0x6ed   :  { %v1227_v33 = vpop.f32.mrf.mxu0 }
 0x6ee   :  { %v1228_v0 = vadd.f32 %v1227_v33, %v1136_v48  ;;  %v1267_v2 = vmax.f32 %v1233_v62, 0.0 }
 0x6ef   :  { %v2497_v42 = vpop.f32.mrf.mxu0 }
 0x6f0   :  { %v1243_v56 = vadd.f32 %v2497_v42, %v1136_v48  ;;  %v1266_v4 = vmax.f32 %v1228_v0, 0.0 }
 0x6f1   :  { %v1237_v44 = vpop.f32.mrf.mxu0 }
 0x6f2   :  { %v1238_v58 = vadd.f32 %v1237_v44, %v1136_v48  ;;  %v1269_v63 = vmax.f32 %v1243_v56, 0.0 }
 0x6f3   :  { %v2500_v46 = vpop.f32.mrf.mxu0 }
 0x6f4   :  { %v1253_v52 = vadd.f32 %v2500_v46, %v1136_v48  ;;  %v1268_v1 = vmax.f32 %v1238_v58, 0.0 }
 0x6f5   :  { %v1247_v47 = vpop.f32.mrf.mxu0 }
 0x6f6   :  { %v1248_v54 = vadd.f32 %v1247_v47, %v1136_v48  ;;  %v1271_v57 = vmax.f32 %v1253_v52, 0.0  ;;  %v1694_v52 = vsub.s32 7, %v2948_v59 }
 0x6f7   :  { %v2503_v49 = vpop.f32.mrf.mxu0 }
 0x6f8   :  { %v1263_v50 = vadd.f32 %v2503_v49, %v1136_v48  ;;  %v1270_v61 = vmax.f32 %v1248_v54, 0.0 }
 0x6f9   :  { %v1257_v51 = vpop.f32.mrf.mxu0 }
 0x6fa   :  { %v1273_v3 = vmax.f32 %v1263_v50, 0.0  ;;  %v1258_v53 = vadd.f32 %v1257_v51, %v1136_v48  ;;  %v1682_v48 = vsub.s32 6, %v2948_v59 }
 0x6fc   :  { %v1272_v55 = vmax.f32 %v1258_v53, 0.0  ;;  %2504 = vmatprep.subr.mxu1 %v1273_v3 }
 0x6fd   :  { %2505 = vmatpush3.msra.mxu1 %v1273_v3 }
 0x6fe   :  { %2506 = vmatprep.subr.mxu1 %v1272_v55 }
 0x6ff   :  { %2507 = vmatpush3.msra.mxu1 %v1272_v55 }
 0x700   :  { %2508 = vmatprep.subr.mxu1 %v1271_v57 }
 0x701   :  { %2509 = vmatpush3.msra.mxu1 %v1271_v57 }
 0x702   :  { %2510 = vmatprep.subr.mxu1 %v1270_v61 }
 0x703   :  { %2511 = vmatpush3.msra.mxu1 %v1270_v61 }
 0x704   :  { %2512 = vmatprep.subr.mxu1 %v1269_v63 }
 0x705   :  { %2513 = vmatpush3.msra.mxu1 %v1269_v63 }
 0x706   :  { %2514 = vmatprep.subr.mxu1 %v1268_v1 }
 0x707   :  { %2515 = vmatpush3.msra.mxu1 %v1268_v1 }
 0x708   :  { %2516 = vmatprep.subr.mxu1 %v1267_v2 }
 0x709   :  { %2517 = vmatpush3.msra.mxu1 %v1267_v2 }
 0x70a   :  { %2518 = vmatprep.subr.mxu1 %v1266_v4 }
 0x70b   :  { %2519 = vmatpush3.msra.mxu1 %v1266_v4 }
 0x70c   :  { %2521 = vmatmul.mubr.msk.f32.vlgmr.msra.gmra.mxu1 %vm86_vm0, %v2832_v9  ;;  %2552 = vmatprep.subr.mxu1 %v2736_v26  ;;  %v1380_v9 = vld [vmem:[#allocation2 + $0x60] sm:$0xff] }
 0x70d   :  { %2523 = vmatprep.mubr.msk.f32.mxu1 %vm86_vm0, %v2837_v10  ;;  %2538 = vmatprep.subr.mxu0 %v1380_v9 }
 0x70e   :  { %2539 = vmatpush3.msra.mxu0 %v1380_v9 }
 0x70f   :  { %2571 = vmatprep.subr.mxu0 %v2736_v26 }
 0x710   :  { %2524 = vmatmul.mubr.msk.f32.gmra.mxu1 %vm86_vm0, %v2846_v11 }
 0x711   :  { %2526 = vmatprep.mubr.msk.f32.mxu1 %vm86_vm0, %v2851_v12 }
 0x714   :  { %2527 = vmatmul.mubr.msk.f32.gmra.mxu1 %vm86_vm0, %v2860_v13 }
 0x715   :  { %2529 = vmatprep.mubr.msk.f32.mxu1 %vm86_vm0, %v2865_v14 }
 0x718   :  { %2530 = vmatmul.mubr.msk.f32.gmra.mxu1 %vm86_vm0, %v2874_v15 }
 0x719   :  { %2568 = vmatprep.mubr.msk.f32.mxu1 %vm2737_vm2, %v2736_v26 }
 0x7cc   :  { %v2522_v10 = vpop.f32.mrf.mxu1 }
 0x7ce   :  { %v1340_v11 = vpop.f32.mrf.mxu1 }
 0x7cf   :  { %2540 = vmatprep.mubr.msk.f32.mxu0 %vm552_vm3, %v1340_v11 }
 0x7d0   :  { %v2525_v12 = vpop.f32.mrf.mxu1  ;;  %2541 = vmatmul.mubr.msk.f32.vlgmr.msra.gmra.mxu0 %vm552_vm3, %v2522_v10 }
 0x7d2   :  { %v1350_v13 = vpop.f32.mrf.mxu1 }
 0x7d3   :  { %2543 = vmatprep.mubr.msk.f32.mxu0 %vm552_vm3, %v1350_v13 }
 0x7d4   :  { %v2528_v14 = vpop.f32.mrf.mxu1  ;;  %2544 = vmatmul.mubr.msk.f32.gmra.mxu0 %vm552_vm3, %v2525_v12 }
 0x7d6   :  { %v1360_v15 = vpop.f32.mrf.mxu1 }
 0x7d7   :  { %2546 = vmatprep.mubr.msk.f32.mxu0 %vm552_vm3, %v1360_v15 }
 0x7d8   :  { %v2531_v5 = vpop.f32.mrf.mxu1  ;;  %2547 = vmatmul.mubr.msk.f32.gmra.mxu0 %vm552_vm3, %v2528_v14 }
 0x7da   :  { %v1370_v6 = vpop.f32.mrf.mxu1 }
 0x7db   :  { %2549 = vmatprep.mubr.msk.f32.mxu0 %vm552_vm3, %v1370_v6 }
 0x7dc   :  { %2550 = vmatmul.mubr.msk.f32.gmra.mxu0 %vm552_vm3, %v2531_v5 }
 0x7dd   :  { %2587 = vmatprep.mubr.msk.f32.mxu0 %vm2737_vm2, %v2736_v26 }
 0x890   :  { %v3114_v7 = vpop.f32.mrf.mxu0 }
 0x891   :  { %v1584_v32 = vmul.f32 %v3114_v7, %v3114_v7 }
 0x892   :  { %v3116_v8 = vpop.f32.mrf.mxu0 }
 0x893   :  { %v1583_v34 = vmul.f32 %v3116_v8, %v3116_v8 }
 0x894   :  { %v3118_v16 = vpop.f32.mrf.mxu0 }
 0x895   :  { %v1586_v25 = vmul.f32 %v3118_v16, %v3118_v16 }
 0x896   :  { %v3120_v17 = vpop.f32.mrf.mxu0 }
 0x897   :  { %v1585_v27 = vmul.f32 %v3120_v17, %v3120_v17 }
 0x898   :  { %v3122_v18 = vpop.f32.mrf.mxu0 }
 0x899   :  { %v1588_v29 = vmul.f32 %v3122_v18, %v3122_v18 }
 0x89a   :  { %v3124_v19 = vpop.f32.mrf.mxu0 }
 0x89b   :  { %v1587_v24 = vmul.f32 %v3124_v19, %v3124_v19 }
 0x89c   :  { %v3126_v20 = vpop.f32.mrf.mxu0 }
 0x89d   :  { %v1590_v21 = vmul.f32 %v3126_v20, %v3126_v20  ;;  %2553 = vmatpush3.msra.mxu1 %v3126_v20 }
 0x89e   :  { %v3131_v22 = vpop.f32.mrf.mxu0  ;;  %2554 = vmatprep.subr.mxu1 %v2736_v26 }
 0x89f   :  { %v1589_v23 = vmul.f32 %v3131_v22, %v3131_v22  ;;  %2555 = vmatpush3.msra.mxu1 %v3131_v22  ;;  %2572 = vmatpush3.msra.mxu0 %v1590_v21 }
 0x8a0   :  { %2556 = vmatprep.subr.mxu1 %v2736_v26  ;;  %2573 = vmatprep.subr.mxu0 %v2736_v26 }
 0x8a1   :  { %2557 = vmatpush3.msra.mxu1 %v3122_v18  ;;  %2574 = vmatpush3.msra.mxu0 %v1589_v23 }
 0x8a2   :  { %2558 = vmatprep.subr.mxu1 %v2736_v26  ;;  %2575 = vmatprep.subr.mxu0 %v2736_v26 }
 0x8a3   :  { %2559 = vmatpush3.msra.mxu1 %v3124_v19  ;;  %2576 = vmatpush3.msra.mxu0 %v1588_v29 }
 0x8a4   :  { %2560 = vmatprep.subr.mxu1 %v2736_v26  ;;  %2577 = vmatprep.subr.mxu0 %v2736_v26 }
 0x8a5   :  { %2561 = vmatpush3.msra.mxu1 %v3118_v16  ;;  %2578 = vmatpush3.msra.mxu0 %v1587_v24 }
 0x8a6   :  { %2562 = vmatprep.subr.mxu1 %v2736_v26  ;;  %2579 = vmatprep.subr.mxu0 %v2736_v26 }
 0x8a7   :  { %2563 = vmatpush3.msra.mxu1 %v3120_v17  ;;  %2580 = vmatpush3.msra.mxu0 %v1586_v25 }
 0x8a8   :  { %2564 = vmatprep.subr.mxu1 %v2736_v26  ;;  %2581 = vmatprep.subr.mxu0 %v2736_v26 }
 0x8a9   :  { %2565 = vmatpush3.msra.mxu1 %v3114_v7  ;;  %2582 = vmatpush3.msra.mxu0 %v1585_v27 }
 0x8aa   :  { %2566 = vmatprep.subr.mxu1 %v2736_v26  ;;  %2583 = vmatprep.subr.mxu0 %v2736_v26 }
 0x8ab   :  { %2567 = vmatpush3.msra.mxu1 %v3116_v8  ;;  %2584 = vmatpush3.msra.mxu0 %v1584_v32 }
 0x8ac   :  { %2569 = vmatmul.mubr.msk.f32.vlgmr.msra.gmra.mxu1 %vm86_vm0, %v2738_v43  ;;  %2585 = vmatprep.subr.mxu0 %v2736_v26 }
 0x8ad   :  { %2586 = vmatpush3.msra.mxu0 %v1583_v34  ;;  %2590 = vmatprep.subr.mxu1 %v1716_v38 }
 0x8ae   :  { %2588 = vmatmul.mubr.msk.f32.vlgmr.msra.gmra.mxu0 %vm86_vm0, %v2738_v43  ;;  %2591 = vmatpush3.msra.mxu1 %v1716_v38 }
 0x8af   :  { %2592 = vmatprep.subr.mxu1 %v1715_v30 }
 0x8b0   :  { %2593 = vmatpush3.msra.mxu1 %v1715_v30 }
 0x8b1   :  { %2594 = vmatprep.subr.mxu1 %v1714_v39 }
 0x8b2   :  { %2595 = vmatpush3.msra.mxu1 %v1714_v39 }
 0x8b3   :  { %2596 = vmatprep.subr.mxu1 %v1713_v40 }
 0x8b4   :  { %2597 = vmatpush3.msra.mxu1 %v1713_v40 }
 0x96c   :  { %v1579_v31 = vpop.f32.mrf.mxu1 }
 0x96d   :  { %v1661_v28 = vmul.f32 0.015625, %v1579_v31 }
 0x96e   :  { %v2570_v37 = vpop.f32.mrf.mxu1  ;;  %v1657_v26 = vpop.f32.mrf.mxu0 }
 0x96f   :  { %v1663_v35 = vmul.f32 %v1661_v28, %v1661_v28  ;;  %v1662_v41 = vmul.f32 0.015625, %v1657_v26 }
 0x970   :  { %v2589_v36 = vpop.f32.mrf.mxu0 }
 0x971   :  { %v1664_v43 = vsub.f32 %v1662_v41, %v1663_v35 }
 0x973   :  { %v1665_v33 = vmax.f32 %v1664_v43, 0.0 }
 0x975   :  { %v1666_v42 = vadd.f32 1e-05, %v1665_v33 }
 0x977   :  { %2643 = vrsqrt.f32 %v1666_v42 }
 0x984   :  { %v2644_v44 = vpop.eup %2643 }
 0x985   :  { %v1669_v45 = vrot.slane %v2644_v44, 2  ;;  %v2103_v44 = vld [vmem:[%s3215_s6] ss:$0 sm:$0xff]  ;;  %s2011_s6 = sshll.u32 %s2739_s26, 4  ;;  %s2012_s6 = int_to_ptr.vmem [resolvable:$true] %s2011_s6 }
 0x986   :  { %s2705_s27 = scalar_lea.vmem %s2012_s6, 1024  ;;  %p2710_p2 = scmp.lt.s32.totalorder %s2012_s6, %s2012_s6 }
 0x987   :  { %v1671_v46 = vmul.f32 %v1669_v45, %v2950_v60  ;;  %p2706_p1 = scmp.ne.s32.totalorder %s2012_s6, %s2705_s27  ;;  %p2711_p3 = scmp.lt.s32.totalorder %s2705_s27, %s2705_s27 }
 0x989   :  { %v1673_v47 = vrot.slane %v1671_v46, 6  ;;  %v1683_v51 = vrot.slane %v1671_v46, %v1682_v48  ;;  %p2712_p4 = por %p2711_p3, %p2710_p2 }
 0x98b   :  { %v1675_v49 = vmul.f32 %v1673_v47, %v1661_v28  ;;  %v1684_v54 = vmul.f32 %v1683_v51, %v3116_v8  ;;  %v1685_v55 = vmul.f32 %v3114_v7, %v1683_v51  ;;  %v1686_v56 = vmul.f32 %v1683_v51, %v3120_v17  ;;  %v1861_v8 = vld [vmem:[#allocation7 + $0x18] sm:$0xff]  ;;  %v1859_v17 = vld [vmem:[#allocation7 + $0x8] sm:$0xff]  ;;  %p2713_p5 = pnand %p2712_p4, %p2706_p1 }
 0x98c   :  { %v1687_v62 = vmul.f32 %v3118_v16, %v1683_v51  ;;  %v1688_v1 = vmul.f32 %v1683_v51, %v3124_v19  ;;  %v1689_v4 = vmul.f32 %v3122_v18, %v1683_v51  ;;  %v1690_v9 = vmul.f32 %v1683_v51, %v3131_v22  ;;  %2610 = vmatprep.subr.mxu0 %v1861_v8  ;;  %v1860_v16 = vld [vmem:[#allocation7 + $0x10] sm:$0xff]  ;;  %v1858_v18 = vld [vmem:[#allocation7] sm:$0xff]  ;;  %v2094_v19 = vld [vmem:[#allocation5 + $0x8] ss:$0 sm:$0xff] }
 0x98d   :  { %v1677_v50 = vrot.slane %v1675_v49, 1  ;;  %v1691_v14 = vmul.f32 %v3126_v20, %v1683_v51  ;;  %2611 = vmatpush3.msra.mxu0 %v1861_v8 }
 0x98e   :  { %2612 = vmatprep.subr.mxu0 %v1860_v16 }
 0x98f   :  { %v1679_v3 = vsub.f32 %v2950_v60, %v1677_v50  ;;  %2613 = vmatpush3.msra.mxu0 %v1860_v16 }
 0x990   :  { %2614 = vmatprep.subr.mxu0 %v1859_v17 }
 0x991   :  { %v1695_v53 = vrot.slane %v1679_v3, %v1694_v52  ;;  %2615 = vmatpush3.msra.mxu0 %v1859_v17 }
 0x992   :  { %2616 = vmatprep.subr.mxu0 %v1858_v18 }
 0x993   :  { %v1696_v57 = vadd.f32 %v1695_v53, %v1684_v54  ;;  %v1697_v58 = vadd.f32 %v1695_v53, %v1685_v55  ;;  %v1698_v61 = vadd.f32 %v1695_v53, %v1686_v56  ;;  %v1699_v2 = vadd.f32 %v1695_v53, %v1687_v62  ;;  %2617 = vmatpush3.msra.mxu0 %v1858_v18 }
 0x994   :  { %v1700_v60 = vadd.f32 %v1695_v53, %v1688_v1  ;;  %v1701_v11 = vadd.f32 %v1695_v53, %v1689_v4  ;;  %v1702_v13 = vadd.f32 %v1695_v53, %v1690_v9  ;;  %v1703_v5 = vadd.f32 %v1695_v53, %v1691_v14 }
 0x995   :  { %v1704_v63 = vmax.f32 %v1696_v57, 0.0  ;;  %v1705_v0 = vmax.f32 %v1697_v58, 0.0  ;;  %v1706_v59 = vmax.f32 %v1698_v61, 0.0  ;;  %v1707_v10 = vmax.f32 %v1699_v2, 0.0 }
 0x996   :  { %v1708_v12 = vmax.f32 %v1700_v60, 0.0  ;;  %v1709_v15 = vmax.f32 %v1701_v11, 0.0  ;;  %v1710_v6 = vmax.f32 %v1702_v13, 0.0  ;;  %v1711_v7 = vmax.f32 %v1703_v5, 0.0 }
 0x997   :  { %2598 = vmatprep.mubr.msk.f32.mxu1 %vm552_vm3, %v1704_v63 }
 0x998   :  { %2599 = vmatmul.mubr.msk.f32.vlgmr.msra.gmra.mxu1 %vm552_vm3, %v1705_v0 }
 0x999   :  { %2601 = vmatprep.mubr.msk.f32.mxu1 %vm552_vm3, %v1706_v59 }
 0x99c   :  { %2602 = vmatmul.mubr.msk.f32.gmra.mxu1 %vm552_vm3, %v1707_v10 }
 0x99d   :  { %2604 = vmatprep.mubr.msk.f32.mxu1 %vm552_vm3, %v1708_v12 }
 0x9a0   :  { %2605 = vmatmul.mubr.msk.f32.gmra.mxu1 %vm552_vm3, %v1709_v15 }
 0x9a1   :  { %2607 = vmatprep.mubr.msk.f32.mxu1 %vm552_vm3, %v1710_v6 }
 0x9a4   :  { %2608 = vmatmul.mubr.msk.f32.gmra.mxu1 %vm552_vm3, %v1711_v7 }
 0xa58   :  { %v2600_v20 = vpop.f32.mrf.mxu1 }
 0xa59   :  { %v1817_v21 = vadd.f32 %v2600_v20, %v2094_v19 }
 0xa5a   :  { %v1811_v22 = vpop.f32.mrf.mxu1 }
 0xa5b   :  { %v1812_v23 = vadd.f32 %v2094_v19, %v1811_v22  ;;  %v1851_v25 = vmax.f32 %v1817_v21, 0.0 }
 0xa5c   :  { %v2603_v29 = vpop.f32.mrf.mxu1 }
 0xa5d   :  { %v1850_v24 = vmax.f32 %v1812_v23, 0.0  ;;  %v1827_v27 = vadd.f32 %v2603_v29, %v2094_v19 }
 0xa5e   :  { %v1821_v32 = vpop.f32.mrf.mxu1 }
 0xa5f   :  { %v1822_v34 = vadd.f32 %v2094_v19, %v1821_v32  ;;  %2618 = vmatprep.mubr.msk.f32.mxu0 %vm552_vm3, %v1850_v24  ;;  %v1853_v39 = vmax.f32 %v1827_v27, 0.0 }
 0xa60   :  { %v2606_v38 = vpop.f32.mrf.mxu1  ;;  %2619 = vmatmul.mubr.msk.f32.vlgmr.msra.gmra.mxu0 %vm552_vm3, %v1851_v25 }
 0xa61   :  { %v1852_v30 = vmax.f32 %v1822_v34, 0.0  ;;  %v1837_v40 = vadd.f32 %v2606_v38, %v2094_v19 }
 0xa62   :  { %v1831_v31 = vpop.f32.mrf.mxu1 }
 0xa63   :  { %v1832_v28 = vadd.f32 %v2094_v19, %v1831_v31  ;;  %2621 = vmatprep.mubr.msk.f32.mxu0 %vm552_vm3, %v1852_v30  ;;  %v1855_v35 = vmax.f32 %v1837_v40, 0.0 }
 0xa64   :  { %v2609_v37 = vpop.f32.mrf.mxu1  ;;  %2622 = vmatmul.mubr.msk.f32.gmra.mxu0 %vm552_vm3, %v1853_v39 }
 0xa65   :  { %v1854_v26 = vmax.f32 %v1832_v28, 0.0  ;;  %v1847_v41 = vadd.f32 %v2609_v37, %v2094_v19 }
 0xa66   :  { %v1841_v36 = vpop.f32.mrf.mxu1 }
 0xa67   :  { %v1842_v43 = vadd.f32 %v2094_v19, %v1841_v36  ;;  %2624 = vmatprep.mubr.msk.f32.mxu0 %vm552_vm3, %v1854_v26  ;;  %v1857_v42 = vmax.f32 %v1847_v41, 0.0 }
 0xa68   :  { %2625 = vmatmul.mubr.msk.f32.gmra.mxu0 %vm552_vm3, %v1855_v35 }
 0xa69   :  { %v1856_v33 = vmax.f32 %v1842_v43, 0.0 }
 0xa6b   :  { %2627 = vmatprep.mubr.msk.f32.mxu0 %vm552_vm3, %v1856_v33 }
 0xa6c   :  { %2628 = vmatmul.mubr.msk.f32.gmra.mxu0 %vm552_vm3, %v1857_v42 }
 0xb20   :  { %v2620_v45 = vpop.f32.mrf.mxu0 }
 0xb21   :  { %v1965_v46 = vadd.f32 %v2620_v45, %v2103_v44 }
 0xb22   :  { %v1959_v47 = vpop.f32.mrf.mxu0 }
 0xb23   :  { %1999 = vst [vmem:[#allocation8 + $0x8] sm:$0xff] %v1965_v46  ;;  %v1960_v48 = vadd.f32 %v2103_v44, %v1959_v47 }
 0xb24   :  { %v2623_v49 = vpop.f32.mrf.mxu0 }
 0xb25   :  { %1998 = vst [vmem:[#allocation8] sm:$0xff] %v1960_v48  ;;  %v1975_v50 = vadd.f32 %v2623_v49, %v2103_v44 }
 0xb26   :  { %v1969_v51 = vpop.f32.mrf.mxu0 }
 0xb27   :  { %2001 = vst [vmem:[#allocation8 + $0x18] sm:$0xff] %v1975_v50  ;;  %v1970_v52 = vadd.f32 %v2103_v44, %v1969_v51 }
 0xb28   :  { %v2626_v3 = vpop.f32.mrf.mxu0 }
 0xb29   :  { %2000 = vst [vmem:[#allocation8 + $0x10] sm:$0xff] %v1970_v52  ;;  %v1985_v53 = vadd.f32 %v2626_v3, %v2103_v44 }
 0xb2a   :  { %v1979_v54 = vpop.f32.mrf.mxu0 }
 0xb2b   :  { %2003 = vst [vmem:[#allocation8 + $0x28] sm:$0xff] %v1985_v53  ;;  %v1980_v55 = vadd.f32 %v2103_v44, %v1979_v54 }
 0xb2c   :  { %v2629_v56 = vpop.f32.mrf.mxu0 }
 0xb2d   :  { %2002 = vst [vmem:[#allocation8 + $0x20] sm:$0xff] %v1980_v55  ;;  %v1995_v57 = vadd.f32 %v2629_v56, %v2103_v44 }
 0xb2e   :  { %v1989_v58 = vpop.f32.mrf.mxu0 }
 0xb2f   :  { %2005 = vst [vmem:[#allocation8 + $0x38] sm:$0xff] %v1995_v57  ;;  %v1990_v61 = vadd.f32 %v2103_v44, %v1989_v58 }
 0xb31   :  { %2004 = vst [vmem:[#allocation8 + $0x30] sm:$0xff] %v1990_v61 }
 0xb32   :  { %2716 = shalt.err (!%p2713_p5)
}
 0xb33   :  { %2017 = dma.vmem_to_hbm [thread:$0]  %s2012_s6, 1024, %s3216_s7, [#allocation4], %s2733_s29, %s2733_s29, %s2734_s30  }
 0xb34   :  { %2729 = dma.done.wait [#allocation4], 1024  }
 0xb35   :  { %2730 = vsyncadd [#allocation4], 4294966272 }
 0xb36   :  { %2021 = vsyncpa [#allocation3], 1 }
 0xb37   :  { %2022 = vsyncpa [#allocation6], 1 }
 0xb38   :  { %2023 = vsyncpa [#allocation4], 1 }

</bundles_post_ra>
